<compile_context>
chip_gen: v5e
topology: v5e:2x2
jax: 0.10.0
libtpu: 0.0.40
codegen_flags: <defaults>
</compile_context>

<pallas_src>
import jax
import jax.numpy as jnp
import numpy as np
from jax.experimental import pallas as pl
from jax.experimental.pallas import tpu as pltpu

# Tile caps. Double-buffered working set at these caps is ~10 MiB (bf16 inputs,
# f32 output), comfortably inside every generation's VMEM (v7x: 64 MiB / TC).
_TM_CAP = 512
_TN_CAP = 512
_TK_CAP = 2048


def _round_up(x, m):
    return ((x + m - 1) // m) * m


def _pick_tile(dim_padded, cap, align):
    """Whole dim if it fits under `cap`; else the largest multiple of `align`
    <= cap that exactly divides `dim_padded` (no padding waste); else `align`."""
    if dim_padded <= cap:
        return dim_padded
    t = cap - (cap % align)
    while t >= align:
        if dim_padded % t == 0:
            return t
        t -= align
    return align


def linear_kernel(x_ref, w_ref, b_ref, o_ref):
    """One (i, j, k) grid step of y = x @ W_t + b, W_t pre-transposed to (K, N).

    x_ref: (tm, tk) bf16 activation tile
    w_ref: (tk, tn) bf16 weight tile (already (F_in, F_out) layout; consumed by
           the MXU directly, no in-kernel / per-step transpose)
    b_ref: (1, tn)  f32 bias tile
    o_ref: (tm, tn) f32 output tile — doubles as the K-axis accumulator, so no
           separate VMEM scratch is needed (output dtype is already f32).
    """
    k = pl.program_id(2)

    @pl.when(k == 0)
    def _():
        o_ref[...] = jnp.zeros_like(o_ref)

    o_ref[...] += jax.lax.dot_general(
        x_ref[...], w_ref[...],
        dimension_numbers=(((1,), (0,)), ((), ())),
        preferred_element_type=jnp.float32)

    @pl.when(k == pl.num_programs(2) - 1)
    def _():
        # Bias added exactly once, in the finalize phase.
        o_ref[...] += b_ref[...]


def embedding_net_forward(x, weight, bias):
    """EmbeddingNet.forward: y = x @ W.T + b (PyTorch nn.Linear semantics).

    x:      (B, F_in)      float32
    weight: (F_out, F_in)  float32   (PyTorch layout)
    bias:   (F_out,)       float32
    Intended to be wrapped in jax.jit so the pad/transpose/bf16-cast glue fuses.
    """
    B, F_in = x.shape
    F_out, F_in_w = weight.shape
    assert F_in_w == F_in, "weight must be (F_out, F_in)"

    # bf16 operands -> second-minor tile of 16; lane dims aligned to 128.
    Mp = _round_up(B, 16)
    Kp = _round_up(F_in, 128)
    Np = _round_up(F_out, 128)

    tm = _pick_tile(Mp, _TM_CAP, 16)
    tk = _pick_tile(Kp, _TK_CAP, 128)
    tn = _pick_tile(Np, _TN_CAP, 128)

    M = _round_up(Mp, tm)
    K = _round_up(Kp, tk)
    N = _round_up(Np, tn)

    # Zero-pad to tile multiples; zeros do not change x @ W.T. Weight is
    # transposed once here to (F_in, F_out) so the kernel never transposes.
    x_p = jnp.pad(x, ((0, M - B), (0, K - F_in))).astype(jnp.bfloat16)
    w_p = jnp.pad(weight.T, ((0, K - F_in), (0, N - F_out))).astype(jnp.bfloat16)
    b_p = jnp.pad(bias, (0, N - F_out)).reshape(1, N).astype(jnp.float32)

    grid = (M // tm, N // tn, K // tk)

    # Double-buffered bf16 input tiles + bias, plus double-buffered f32 output.
    vmem_bytes = 2 * (tm * tk * 2 + tk * tn * 2 + tn * 4) + 2 * (tm * tn * 4)
    vmem_limit = int(min(max(2 * vmem_bytes, 16 << 20), 32 << 20))

    cost = pl.CostEstimate(
        flops=2 * M * N * K,
        bytes_accessed=2 * (M * K + K * N) + 4 * (M * N + N),
        transcendentals=0)

    out_p = pl.pallas_call(
        linear_kernel,
        out_shape=jax.ShapeDtypeStruct((M, N), jnp.float32),
        grid_spec=pltpu.PrefetchScalarGridSpec(
            num_scalar_prefetch=0,
            grid=grid,
            in_specs=[
                pl.BlockSpec((tm, tk), lambda i, j, k: (i, k)),   # x (bf16)
                pl.BlockSpec((tk, tn), lambda i, j, k: (k, j)),   # W.T (bf16)
                pl.BlockSpec((1, tn), lambda i, j, k: (0, j)),    # bias (f32)
            ],
            out_specs=pl.BlockSpec((tm, tn), lambda i, j, k: (i, j)),
        ),
        compiler_params=pltpu.CompilerParams(
            dimension_semantics=("parallel", "parallel", "arbitrary"),
            vmem_limit_bytes=vmem_limit),
        cost_estimate=cost,
    )(x_p, w_p, b_p)

    return out_p[:B, :F_out].astype(x.dtype)


if __name__ == "__main__":
    forward = jax.jit(embedding_net_forward)

    def make_linear_inputs(key, batch, f_in, f_out):
        kx, kw, kb = jax.random.split(key, 3)
        # PyTorch default Linear init: U(-1/sqrt(fan_in), 1/sqrt(fan_in)).
        bound = float(1.0 / np.sqrt(f_in))
        w = jax.random.uniform(kw, (f_out, f_in), jnp.float32, -bound, bound)
        b = jax.random.uniform(kb, (f_out,), jnp.float32, -bound, bound)
        x = jax.random.normal(kx, (batch, f_in), dtype=jnp.float32)
        return x, w, b

    def check(x, w, b, rtol=2e-2, atol=2e-2):
        out = jax.block_until_ready(forward(x, w, b))
        ref = (np.asarray(x, np.float64) @ np.asarray(w, np.float64).T
               + np.asarray(b, np.float64))
        assert out.shape == ref.shape
        err = float(np.max(np.abs(np.asarray(out, np.float64) - ref)))
        assert np.allclose(np.asarray(out, np.float64), ref,
                           rtol=rtol, atol=atol), f"max abs err {err}"
        return out

    key = jax.random.PRNGKey(0)
    k1, k2, k3 = jax.random.split(key, 3)

    # 1) The actual module config: EmbeddingNet(in_features=3), batch=8.
    #    (Pads to one (16,128)x(128,128) tile; Pallas kept per spec even though
    #    a plain jitted x @ W.T + b would be at least as fast at this size.)
    check(*make_linear_inputs(k1, batch=8, f_in=3, f_out=3))

    # 2) "Whole problem in VMEM" path from the review: grid collapses to (1,1,1)
    #    with tm=512, tk=1024, tn=384 (no N padding waste).
    check(*make_linear_inputs(k2, batch=512, f_in=1024, f_out=384))

    # 3) Multi-tile K path: exercises in-place K accumulation in o_ref and the
    #    finalize-phase bias add (grid = (1, 1, 2)).
    check(*make_linear_inputs(k3, batch=48, f_in=4096, f_out=256))

    print("KERNEL_OK")
</pallas_src>

<mosaic_0001>
module attributes {stable_mosaic.version = 11 : i64} {
  func.func @linear_kernel(%arg0: i32, %arg1: i32, %arg2: i32, %arg3: memref<16x128xbf16, #tpu.memory_space<vmem>>, %arg4: memref<128x128xbf16, #tpu.memory_space<vmem>>, %arg5: memref<1x128xf32, #tpu.memory_space<vmem>>, %arg6: memref<16x128xf32, #tpu.memory_space<vmem>>) attributes {dimension_semantics = [#tpu.dimension_semantics<parallel>, #tpu.dimension_semantics<parallel>, #tpu.dimension_semantics<arbitrary>], iteration_bounds = array<i64: 1, 1, 1>, scalar_prefetch = 0 : i64, scratch_operands = 0 : i64, tpu.core_type = #tpu.core_type<tc>, window_params = [{transform_indices = @transform_0, window_bounds = array<i64: 16, 128>}, {transform_indices = @transform_1, window_bounds = array<i64: 128, 128>}, {transform_indices = @transform_2, window_bounds = array<i64: 1, 128>}, {transform_indices = @transform_3, window_bounds = array<i64: 16, 128>}]} {
    %c0_i32 = arith.constant 0 : i32
    %0 = arith.cmpi eq, %arg2, %c0_i32 : i32
    %1 = arith.extui %0 : i1 to i32
    %c0_i32_0 = arith.constant 0 : i32
    %2 = arith.cmpi ne, %1, %c0_i32_0 : i32
    scf.if %2 {
      %cst_10 = arith.constant 0.000000e+00 : f32
      %12 = vector.broadcast %cst_10 : f32 to vector<16x128xf32>
      %c0_11 = arith.constant 0 : index
      %c0_12 = arith.constant 0 : index
      %13 = vector.load %arg6[%c0_11, %c0_12] : memref<16x128xf32, #tpu.memory_space<vmem>>, vector<16x128xf32>
      tpu.vector_store %arg6[%c0_11, %c0_12], %12 {strides = array<i32>} : memref<16x128xf32, #tpu.memory_space<vmem>>, vector<16x128xf32>,
    } else {
    }
    %c0 = arith.constant 0 : index
    %c0_1 = arith.constant 0 : index
    %3 = vector.load %arg6[%c0, %c0_1] : memref<16x128xf32, #tpu.memory_space<vmem>>, vector<16x128xf32>
    %c0_2 = arith.constant 0 : index
    %c0_3 = arith.constant 0 : index
    %4 = vector.load %arg3[%c0_2, %c0_3] : memref<16x128xbf16, #tpu.memory_space<vmem>>, vector<16x128xbf16>
    %c0_4 = arith.constant 0 : index
    %c0_5 = arith.constant 0 : index
    %5 = vector.load %arg4[%c0_4, %c0_5] : memref<128x128xbf16, #tpu.memory_space<vmem>>, vector<128x128xbf16>
    %cst = arith.constant dense<0.000000e+00> : vector<16x128xf32>
    %6 = tpu.matmul %4, %5, %cst {dimension_numbers = #tpu.dot_dimension_numbers<[1], [0], [0], [1], [0, 0, 1, 1], [], []>} : vector<16x128xbf16>, vector<128x128xbf16>, vector<16x128xf32> -> vector<16x128xf32>
    %7 = arith.addf %3, %6 : vector<16x128xf32>
    %c0_6 = arith.constant 0 : index
    %c0_7 = arith.constant 0 : index
    %8 = vector.load %arg6[%c0_6, %c0_7] : memref<16x128xf32, #tpu.memory_space<vmem>>, vector<16x128xf32>
    tpu.vector_store %arg6[%c0_6, %c0_7], %7 {strides = array<i32>} : memref<16x128xf32, #tpu.memory_space<vmem>>, vector<16x128xf32>,
    %c0_i32_8 = arith.constant 0 : i32
    %9 = arith.cmpi eq, %arg2, %c0_i32_8 : i32
    %10 = arith.extui %9 : i1 to i32
    %c0_i32_9 = arith.constant 0 : i32
    %11 = arith.cmpi ne, %10, %c0_i32_9 : i32
    scf.if %11 {
      %c0_10 = arith.constant 0 : index
      %c0_11 = arith.constant 0 : index
      %12 = vector.load %arg6[%c0_10, %c0_11] : memref<16x128xf32, #tpu.memory_space<vmem>>, vector<16x128xf32>
      %c0_12 = arith.constant 0 : index
      %c0_13 = arith.constant 0 : index
      %13 = vector.load %arg5[%c0_12, %c0_13] : memref<1x128xf32, #tpu.memory_space<vmem>>, vector<1x128xf32>
      %14 = vector.broadcast %13 : vector<1x128xf32> to vector<16x128xf32>
      %15 = arith.addf %12, %14 : vector<16x128xf32>
      %c0_14 = arith.constant 0 : index
      %c0_15 = arith.constant 0 : index
      %16 = vector.load %arg6[%c0_14, %c0_15] : memref<16x128xf32, #tpu.memory_space<vmem>>, vector<16x128xf32>
      tpu.vector_store %arg6[%c0_14, %c0_15], %15 {strides = array<i32>} : memref<16x128xf32, #tpu.memory_space<vmem>>, vector<16x128xf32>,
    } else {
    }
    return
  }
  func.func @transform_0(%arg0: i32, %arg1: i32, %arg2: i32) -> (i32, i32) {
    %c0_i32 = arith.constant 0 : i32
    return %arg0, %arg2 : i32, i32
  }
  func.func @transform_1(%arg0: i32, %arg1: i32, %arg2: i32) -> (i32, i32) {
    %c0_i32 = arith.constant 0 : i32
    return %arg2, %arg1 : i32, i32
  }
  func.func @transform_2(%arg0: i32, %arg1: i32, %arg2: i32) -> (i32, i32) {
    %c0_i32 = arith.constant 0 : i32
    %c0_i32_0 = arith.constant 0 : i32
    return %c0_i32, %arg1 : i32, i32
  }
  func.func @transform_3(%arg0: i32, %arg1: i32, %arg2: i32) -> (i32, i32) {
    %c0_i32 = arith.constant 0 : i32
    return %arg0, %arg1 : i32, i32
  }
}

</mosaic_0001>

<bundles_post_ra>
// kernel: embedding_net_forward.1
= control target key start
LH: loop header
LB: loop body
LE: loop exit
PB: predicated region body
PF: predicated region fallthrough
CT: control target
= control target key end

     0   :  { %s232_s1 = inlined_call_operand.vmem [shape: bf16[128,128], index: 1, kind: input, shape index: {}]   ;;  %s233_s2 = inlined_call_operand.vmem [shape: f32[1,128], index: 2, kind: input, shape index: {}]   ;;  %s234_s0 = inlined_call_operand.vmem [shape: bf16[16,128], index: 0, kind: input, shape index: {}]   ;;  %s235_s3 = inlined_call_operand.vmem [shape: f32[16,128], index: 3, kind: output, shape index: {}]  }
   0x1   :  { %v173_v0 = vld [vmem:[%s232_s1 + $0x38] sm:$0xff]  ;;  %v172_v1 = vld [vmem:[%s232_s1 + $0x30] sm:$0xff]  ;;  %v171_v2 = vld [vmem:[%s232_s1 + $0x28] sm:$0xff] }
   0x2   :  { %94 = vmatpush.bf16.msra.mxu0 %v173_v0  ;;  %v170_v3 = vld [vmem:[%s232_s1 + $0x20] sm:$0xff]  ;;  %v169_v4 = vld [vmem:[%s232_s1 + $0x18] sm:$0xff]  ;;  %v168_v5 = vld [vmem:[%s232_s1 + $0x10] sm:$0xff] }
   0x3   :  { %v167_v6 = vld [vmem:[%s232_s1 + $0x8] sm:$0xff]  ;;  %v166_v7 = vld [vmem:[%s232_s1] sm:$0xff] }
   0x4   :  { %v165_v8 = vld [vmem:[%s234_s0] sm:$0xff] }
   0x5   :  { %v175_v9 = vld [vmem:[%s233_s2] ss:$0 sm:$0xff] }
   0x6   :  { %95 = vmatpush.bf16.msra.mxu0 %v172_v1 }
   0xa   :  { %96 = vmatpush.bf16.msra.mxu0 %v171_v2 }
   0xe   :  { %97 = vmatpush.bf16.msra.mxu0 %v170_v3 }
  0x12   :  { %98 = vmatpush.bf16.msra.mxu0 %v169_v4 }
  0x16   :  { %99 = vmatpush.bf16.msra.mxu0 %v168_v5 }
  0x1a   :  { %100 = vmatpush.bf16.msra.mxu0 %v167_v6 }
  0x1e   :  { %101 = vmatpush.bf16.msra.mxu0 %v166_v7 }
  0x21   :  { %102 = vmatmul.bf16.vlgmr.msra.gmra.mxu0 %v165_v8 }
  0x9e   :  { %v103_v10 = vpop.f32.mrf.mxu0 }
  0x9f   :  { %v121_v11 = vadd.f32 %v175_v9, %v103_v10 }
  0xa1   :  { %123 = vst [vmem:[%s235_s3] sm:$0xff] %v121_v11 }
  0xa6   :  { %v105_v12 = vpop.f32.mrf.mxu0 }
  0xa7   :  { %v122_v13 = vadd.f32 %v175_v9, %v105_v12 }
  0xa9   :  { %124 = vst [vmem:[%s235_s3 + $0x8] sm:$0xff] %v122_v13 }

</bundles_post_ra>
